<compile_context>
chip_gen: v7x
topology: tpu7x:2x2x1
jax: 0.10.0
libtpu: 0.0.40
codegen_flags: <defaults>
</compile_context>

<pallas_src>
import functools

import jax
import jax.numpy as jnp
from jax import lax
from jax.experimental import pallas as pl
from jax.experimental.pallas import tpu as pltpu


def _round_up(a, m):
    return ((a + m - 1) // m) * m


def _cdiv(a, b):
    return -(-a // b)


def _choose_tile(dim, cap, align):
    """Tile <= cap, multiple of `align`, minimizing padding of `dim`."""
    padded = _round_up(dim, align)
    nblocks = _cdiv(padded, cap)
    tile = _round_up(_cdiv(padded, nblocks), align)
    return tile, tile * nblocks


def _vmem_capacity_bytes():
    try:
        return int(pltpu.get_tpu_info().vmem_capacity_bytes)
    except Exception:
        return 64 << 20  # conservative: v7x per-TensorCore VMEM


def _linear_kernel_multi_k(x_ref, w_ref, b_ref, o_ref, acc_ref, *, use_bf16_mxu):
    """One (tm, tn) output tile; K is the innermost (reduction) grid axis.

    x_ref: (tm, tk) activations, w_ref: (tn, tk) weight (PyTorch layout),
    b_ref: (1, tn) bias, o_ref: (tm, tn) output, acc_ref: (tm, tn) f32 scratch.
    """
    k = pl.program_id(2)

    @pl.when(k == 0)
    def _init_acc():
        # Seed the accumulator with the bias: saves a full-tile zero store
        # plus a VPU add in the epilogue.
        acc_ref[...] = jnp.broadcast_to(
            b_ref[...].astype(jnp.float32), acc_ref.shape)

    x = x_ref[...]
    w = w_ref[...]
    if use_bf16_mxu:
        x = x.astype(jnp.bfloat16)
        w = w.astype(jnp.bfloat16)
    # NT contraction over the last dim of both operands: (tm,tk)x(tn,tk)->(tm,tn).
    acc_ref[...] += lax.dot_general(
        x, w,
        dimension_numbers=(((1,), (1,)), ((), ())),
        preferred_element_type=jnp.float32)

    @pl.when(k == pl.num_programs(2) - 1)
    def _store():
        o_ref[...] = acc_ref[...].astype(o_ref.dtype)


def _linear_kernel_single_k(x_ref, w_ref, b_ref, o_ref, *, use_bf16_mxu):
    """Specialized path when the whole K dim fits one tile: no scratch."""
    x = x_ref[...]
    w = w_ref[...]
    if use_bf16_mxu:
        x = x.astype(jnp.bfloat16)
        w = w.astype(jnp.bfloat16)
    acc = lax.dot_general(
        x, w,
        dimension_numbers=(((1,), (1,)), ((), ())),
        preferred_element_type=jnp.float32)
    o_ref[...] = (acc + b_ref[...].astype(jnp.float32)).astype(o_ref.dtype)


@functools.partial(jax.jit, static_argnames=("use_bf16_mxu",))
def fully_connected(x, weight, bias, *, use_bf16_mxu=False):
    """x: (B, Din), weight: (Dout, Din) [PyTorch layout], bias: (Dout,)."""
    B, Din = x.shape
    Dout, Din_w = weight.shape
    assert Din_w == Din and bias.shape == (Dout,)

    vmem_cap = _vmem_capacity_bytes()
    big_vmem = vmem_cap >= (100 << 20)  # v5e/v6e: 128 MiB; v7x: 64 MiB

    # Tile caps (f32). Larger tiles => fewer grid steps & fewer HBM re-fetches.
    tm_cap = 512
    tn_cap = 2048 if big_vmem else 1024
    tk_cap = 2048 if big_vmem else 1024

    tm, Mp = _choose_tile(B, tm_cap, 8)      # sublane-aligned M tile
    tn, Np = _choose_tile(Dout, tn_cap, 128)  # lane-dense N tile, divides Np
    tk, Kp = _choose_tile(Din, tk_cap, 128)   # lane-aligned K tile, divides Kp

    # Megacore: keep the parallel (i, j) grid extent >= 2 when feasible so
    # both TensorCores (v7x) get work. Prefer splitting M (8-alignment => low
    # padding waste); fall back to N.
    if (Mp // tm) * (Np // tn) < 2:
        if Mp >= 16:
            tm = _round_up(_cdiv(Mp, 2), 8)
            Mp = 2 * tm
        elif Np >= 256:
            tn = _round_up(_cdiv(Np, 2), 128)
            Np = 2 * tn

    # Zero-pad to tile multiples (zeros contribute nothing to the K reduction;
    # padded rows/cols are sliced off at the end). NOTE: correctness of the K
    # accumulation relies on this explicit zero pad of Din.
    xp = x if (Mp == B and Kp == Din) else jnp.pad(x, ((0, Mp - B), (0, Kp - Din)))
    wp = weight if (Np == Dout and Kp == Din) else jnp.pad(
        weight, ((0, Np - Dout), (0, Kp - Din)))
    bp = bias if Np == Dout else jnp.pad(bias, (0, Np - Dout))
    b2d = bp.reshape(1, Np)

    grid_m, grid_n, grid_k = Mp // tm, Np // tn, Kp // tk

    itemsize = jnp.dtype(x.dtype).itemsize
    # Real streamed traffic: x is re-fetched once per N block, W once per M block.
    cost = pl.CostEstimate(
        flops=2 * Mp * Kp * Np,
        transcendentals=0,
        bytes_accessed=itemsize * (grid_n * Mp * Kp + grid_m * Np * Kp
                                   + Mp * Np + Np))

    # VMEM budget: double-buffered x/w/out tiles + f32 accumulator + headroom,
    # but never more than ~75% of physical VMEM (leaves compiler scratch room
    # on v7x where 64 MiB is the whole per-core VMEM).
    need = (2 * tm * tk * itemsize + 2 * tn * tk * itemsize
            + 2 * tm * tn * itemsize + tm * tn * 4 + 2 * tn * itemsize)
    vmem_limit = min(int(vmem_cap * 3 // 4), max(48 << 20, need + (16 << 20)))

    if grid_k == 1:
        out = pl.pallas_call(
            functools.partial(_linear_kernel_single_k, use_bf16_mxu=use_bf16_mxu),
            out_shape=jax.ShapeDtypeStruct((Mp, Np), x.dtype),
            grid_spec=pltpu.PrefetchScalarGridSpec(
                num_scalar_prefetch=0,
                grid=(grid_m, grid_n),
                in_specs=[
                    pl.BlockSpec((tm, tk), lambda i, j: (i, 0)),   # x
                    pl.BlockSpec((tn, tk), lambda i, j: (j, 0)),   # W (Dout, Din)
                    pl.BlockSpec((1, tn), lambda i, j: (0, j)),    # bias
                ],
                out_specs=pl.BlockSpec((tm, tn), lambda i, j: (i, j)),
            ),
            compiler_params=pltpu.CompilerParams(
                dimension_semantics=("parallel", "parallel"),
                vmem_limit_bytes=vmem_limit,
            ),
            cost_estimate=cost,
        )(xp, wp, b2d)
    else:
        out = pl.pallas_call(
            functools.partial(_linear_kernel_multi_k, use_bf16_mxu=use_bf16_mxu),
            out_shape=jax.ShapeDtypeStruct((Mp, Np), x.dtype),
            grid_spec=pltpu.PrefetchScalarGridSpec(
                num_scalar_prefetch=0,
                grid=(grid_m, grid_n, grid_k),
                in_specs=[
                    pl.BlockSpec((tm, tk), lambda i, j, k: (i, k)),   # x
                    pl.BlockSpec((tn, tk), lambda i, j, k: (j, k)),   # W (Dout, Din)
                    pl.BlockSpec((1, tn), lambda i, j, k: (0, j)),    # bias
                ],
                out_specs=pl.BlockSpec((tm, tn), lambda i, j, k: (i, j)),
                scratch_shapes=[pltpu.VMEM((tm, tn), jnp.float32)],
            ),
            compiler_params=pltpu.CompilerParams(
                dimension_semantics=("parallel", "parallel", "arbitrary"),
                vmem_limit_bytes=vmem_limit,
            ),
            cost_estimate=cost,
        )(xp, wp, b2d)

    if Mp != B or Np != Dout:
        out = out[:B, :Dout]
    return out


if __name__ == "__main__":
    key = jax.random.PRNGKey(0)

    # --- Small shapes consistent with nn.Linear(input_dim, output_dim) ---
    batch, input_dim, output_dim = 8, 32, 16
    kx, kw, kb = jax.random.split(key, 3)
    bound = 1.0 / (input_dim ** 0.5)
    x = jax.random.normal(kx, (batch, input_dim), dtype=jnp.float32)
    weight = jax.random.uniform(kw, (output_dim, input_dim),
                                minval=-bound, maxval=bound, dtype=jnp.float32)
    bias = jax.random.uniform(kb, (output_dim,),
                              minval=-bound, maxval=bound, dtype=jnp.float32)

    out = fully_connected(x, weight, bias)
    jax.block_until_ready(out)
    ref = x @ weight.T + bias
    assert out.shape == (batch, output_dim)
    assert jnp.allclose(out, ref, atol=1e-5, rtol=1e-5)

    # --- Single-K-tile path + megacore split + no weight padding (Dout=640) ---
    B2, Din2, Dout2 = 256, 1024, 640
    k2x, k2w, k2b = jax.random.split(jax.random.PRNGKey(1), 3)
    bound2 = 1.0 / (Din2 ** 0.5)
    x2 = jax.random.normal(k2x, (B2, Din2), dtype=jnp.float32)
    w2 = jax.random.uniform(k2w, (Dout2, Din2),
                            minval=-bound2, maxval=bound2, dtype=jnp.float32)
    b2 = jax.random.uniform(k2b, (Dout2,),
                            minval=-bound2, maxval=bound2, dtype=jnp.float32)
    out2 = fully_connected(x2, w2, b2)
    jax.block_until_ready(out2)
    ref2 = x2 @ w2.T + b2
    assert out2.shape == (B2, Dout2)
    assert jnp.allclose(out2, ref2, atol=1e-4, rtol=1e-4)

    # --- Multi-K-tile accumulator path (Din larger than the tk cap) ---
    B3, Din3, Dout3 = 64, 4096, 384
    k3x, k3w, k3b = jax.random.split(jax.random.PRNGKey(2), 3)
    bound3 = 1.0 / (Din3 ** 0.5)
    x3 = jax.random.normal(k3x, (B3, Din3), dtype=jnp.float32)
    w3 = jax.random.uniform(k3w, (Dout3, Din3),
                            minval=-bound3, maxval=bound3, dtype=jnp.float32)
    b3 = jax.random.uniform(k3b, (Dout3,),
                            minval=-bound3, maxval=bound3, dtype=jnp.float32)
    out3 = fully_connected(x3, w3, b3)
    jax.block_until_ready(out3)
    ref3 = x3 @ w3.T + b3
    assert out3.shape == (B3, Dout3)
    assert jnp.allclose(out3, ref3, atol=2e-4, rtol=1e-4)

    print("KERNEL_OK")
</pallas_src>

<mosaic_0001>
module attributes {stable_mosaic.version = 11 : i64} {
  func.func @_linear_kernel_single_k(%arg0: i32, %arg1: i32, %arg2: memref<8x128xf32, #tpu.memory_space<vmem>>, %arg3: memref<128x128xf32, #tpu.memory_space<vmem>>, %arg4: memref<1x128xf32, #tpu.memory_space<vmem>>, %arg5: memref<8x128xf32, #tpu.memory_space<vmem>>) attributes {dimension_semantics = [#tpu.dimension_semantics<parallel>, #tpu.dimension_semantics<parallel>], iteration_bounds = array<i64: 1, 1>, scalar_prefetch = 0 : i64, scratch_operands = 0 : i64, tpu.core_type = #tpu.core_type<tc>, window_params = [{transform_indices = @transform_0, window_bounds = array<i64: 8, 128>}, {transform_indices = @transform_1, window_bounds = array<i64: 128, 128>}, {transform_indices = @transform_2, window_bounds = array<i64: 1, 128>}, {transform_indices = @transform_3, window_bounds = array<i64: 8, 128>}]} {
    %c0 = arith.constant 0 : index
    %c0_0 = arith.constant 0 : index
    %0 = vector.load %arg2[%c0, %c0_0] : memref<8x128xf32, #tpu.memory_space<vmem>>, vector<8x128xf32>
    %c0_1 = arith.constant 0 : index
    %c0_2 = arith.constant 0 : index
    %1 = vector.load %arg3[%c0_1, %c0_2] : memref<128x128xf32, #tpu.memory_space<vmem>>, vector<128x128xf32>
    %cst = arith.constant dense<0.000000e+00> : vector<8x128xf32>
    %2 = tpu.matmul %0, %1, %cst {dimension_numbers = #tpu.dot_dimension_numbers<[1], [1], [0], [0], [0, 0, 1, 0], [], []>} : vector<8x128xf32>, vector<128x128xf32>, vector<8x128xf32> -> vector<8x128xf32>
    %c0_3 = arith.constant 0 : index
    %c0_4 = arith.constant 0 : index
    %3 = vector.load %arg4[%c0_3, %c0_4] : memref<1x128xf32, #tpu.memory_space<vmem>>, vector<1x128xf32>
    %4 = vector.broadcast %3 : vector<1x128xf32> to vector<8x128xf32>
    %5 = arith.addf %2, %4 : vector<8x128xf32>
    %c0_5 = arith.constant 0 : index
    %c0_6 = arith.constant 0 : index
    %6 = vector.load %arg5[%c0_5, %c0_6] : memref<8x128xf32, #tpu.memory_space<vmem>>, vector<8x128xf32>
    tpu.vector_store %arg5[%c0_5, %c0_6], %5 {strides = array<i32>} : memref<8x128xf32, #tpu.memory_space<vmem>>, vector<8x128xf32>,
    return
  }
  func.func @transform_0(%arg0: i32, %arg1: i32) -> (i32, i32) {
    %c0_i32 = arith.constant 0 : i32
    %c0_i32_0 = arith.constant 0 : i32
    return %arg0, %c0_i32 : i32, i32
  }
  func.func @transform_1(%arg0: i32, %arg1: i32) -> (i32, i32) {
    %c0_i32 = arith.constant 0 : i32
    %c0_i32_0 = arith.constant 0 : i32
    return %arg1, %c0_i32 : i32, i32
  }
  func.func @transform_2(%arg0: i32, %arg1: i32) -> (i32, i32) {
    %c0_i32 = arith.constant 0 : i32
    %c0_i32_0 = arith.constant 0 : i32
    return %c0_i32, %arg1 : i32, i32
  }
  func.func @transform_3(%arg0: i32, %arg1: i32) -> (i32, i32) {
    %c0_i32 = arith.constant 0 : i32
    return %arg0, %arg1 : i32, i32
  }
}

</mosaic_0001>

<bundles_post_ra>
// kernel: fully_connected.1
= control target key start
LH: loop header
LB: loop body
LE: loop exit
PB: predicated region body
PF: predicated region fallthrough
CT: control target
= control target key end

     0   :  { %v229_v2 = vmov 0.0|0.0   ;;  %vm230_vm0 = vmmov 0   ;;  %v231_v4 = vmov 0.0   ;;  %s319_s0 = inlined_call_operand.vmem [shape: f32[8,128], index: 0, kind: input, shape index: {}]   ;;  %s320_s1 = inlined_call_operand.vmem [shape: f32[128,128], index: 1, kind: input, shape index: {}]   ;;  %s321_s2 = inlined_call_operand.vmem [shape: f32[1,128], index: 2, kind: input, shape index: {}]   ;;  %s322_s3 = inlined_call_operand.hbm [shape: f32[8,128], index: 3, kind: output, shape index: {}]  }
   0x1   :  { %v16_v0 = vld [vmem:[%s320_s1] sm:$0xff]  ;;  %v17_v1 = vld [vmem:[%s320_s1 + $0x8] sm:$0xff]  ;;  %177 = vmatprep.subr.bf16.mxu0 %v229_v2  ;;  %174 = vmatprep.mubr.msk.f32.mxu0 %vm230_vm0, %v231_v4  ;;  %v18_v5 = vld [vmem:[%s320_s1 + $0x10] sm:$0xff] }
   0x2   :  { %v178_v3 = vpack.c.bf16 %v17_v1, %v16_v0  ;;  %v19_v6 = vld [vmem:[%s320_s1 + $0x18] sm:$0xff] }
   0x4   :  { %179 = vmatpush3.bf16.xpose.msra.mxu0 %v178_v3 }
   0x5   :  { %180 = vmatprep.subr.bf16.mxu0 %v229_v2 }
   0x6   :  { %8 = vsyncpa [#allocation3], 0  ;;  %v181_v7 = vpack.c.bf16 %v19_v6, %v18_v5  ;;  %v20_v8 = vld [vmem:[%s320_s1 + $0x20] sm:$0xff]  ;;  %v21_v9 = vld [vmem:[%s320_s1 + $0x28] sm:$0xff]  ;;  %s232_s21 = smov [#allocation2]  }
   0x7   :  { %v184_v10 = vpack.c.bf16 %v21_v9, %v20_v8  ;;  %v22_v11 = vld [vmem:[%s320_s1 + $0x30] sm:$0xff]  ;;  %v23_v12 = vld [vmem:[%s320_s1 + $0x38] sm:$0xff]  ;;  %v24_v14 = vld [vmem:[%s320_s1 + $0x40] sm:$0xff]  ;;  %s116_s22 = sshll.u32 %s232_s21, 4  ;;  %s117_s22 = int_to_ptr.vmem [resolvable:$true] %s116_s22 }
   0x8   :  { %v187_v13 = vpack.c.bf16 %v23_v12, %v22_v11  ;;  %v25_v15 = vld [vmem:[%s320_s1 + $0x48] sm:$0xff]  ;;  %v26_v17 = vld [vmem:[%s320_s1 + $0x50] sm:$0xff]  ;;  %v27_v18 = vld [vmem:[%s320_s1 + $0x58] sm:$0xff]  ;;  %s205_s23 = scalar_lea.vmem %s117_s22, 128  ;;  %p210_p1 = scmp.lt.s32.totalorder %s117_s22, %s117_s22 }
   0x9   :  { %v190_v16 = vpack.c.bf16 %v25_v15, %v24_v14  ;;  %v193_v19 = vpack.c.bf16 %v27_v18, %v26_v17  ;;  %v28_v20 = vld [vmem:[%s320_s1 + $0x60] sm:$0xff]  ;;  %v29_v21 = vld [vmem:[%s320_s1 + $0x68] sm:$0xff]  ;;  %v30_v23 = vld [vmem:[%s320_s1 + $0x70] sm:$0xff]  ;;  %p206_p0 = scmp.ne.s32.totalorder %s117_s22, %s205_s23  ;;  %p211_p2 = scmp.lt.s32.totalorder %s205_s23, %s205_s23 }
   0xa   :  { %v196_v22 = vpack.c.bf16 %v29_v21, %v28_v20  ;;  %v31_v24 = vld [vmem:[%s320_s1 + $0x78] sm:$0xff]  ;;  %v15_v26 = vld [vmem:[%s319_s0] sm:$0xff] }
   0xb   :  { %v199_v25 = vpack.c.bf16 %v31_v24, %v30_v23  ;;  %v124_v27 = vld [vmem:[%s321_s2] ss:$0 sm:$0xff]  ;;  %p212_p3 = por %p211_p2, %p210_p1 }
   0xc   :  { %182 = vmatpush3.bf16.xpose.msra.mxu0 %v181_v7 }
   0xd   :  { %183 = vmatprep.subr.bf16.mxu0 %v229_v2  ;;  %p213_p4 = pnand %p212_p3, %p206_p0 }
  0x14   :  { %185 = vmatpush3.bf16.xpose.msra.mxu0 %v184_v10 }
  0x15   :  { %186 = vmatprep.subr.bf16.mxu0 %v229_v2 }
  0x1c   :  { %188 = vmatpush3.bf16.xpose.msra.mxu0 %v187_v13 }
  0x1d   :  { %189 = vmatprep.subr.bf16.mxu0 %v229_v2 }
  0x24   :  { %191 = vmatpush3.bf16.xpose.msra.mxu0 %v190_v16 }
  0x25   :  { %192 = vmatprep.subr.bf16.mxu0 %v229_v2 }
  0x2c   :  { %194 = vmatpush3.bf16.xpose.msra.mxu0 %v193_v19 }
  0x2d   :  { %195 = vmatprep.subr.bf16.mxu0 %v229_v2 }
  0x34   :  { %197 = vmatpush3.bf16.xpose.msra.mxu0 %v196_v22 }
  0x35   :  { %198 = vmatprep.subr.bf16.mxu0 %v229_v2 }
  0x3c   :  { %200 = vmatpush3.bf16.xpose.msra.mxu0 %v199_v25 }
  0x43   :  { %175 = vmatmul.mubr.f32.vlgmr.msra.gmra.mrb[0].mxu0 %v15_v26 }
 0x116   :  { %v105_v28 = vpop.f32.mrb[0].mxu0 }
 0x117   :  { %v106_v29 = vadd.f32 %v124_v27, %v105_v28  ;;  %v176_v30 = vpop.f32.mrb[1].mxu0 }
 0x119   :  { %109 = vst [vmem:[#allocation2] sm:$0xff] %v106_v29 }
 0x11a   :  { %216 = shalt.err (!%p213_p4)
}
 0x11b   :  { %s217_s24 = scalar_lea.hbm %s322_s3, 128 }
 0x11c   :  { %p218_p5 = scmp.ne.s32.totalorder %s322_s3, %s217_s24  ;;  %p221_p6 = scmp.lt.u32.totalorder %s217_s24, %s322_s3 }
 0x11e   :  { %p223_p7 = pnand %p221_p6, %p218_p5 }
 0x120   :  { %226 = shalt.err (!%p223_p7)
}
 0x121   :  { %119 = dma.vmem_to_hbm [thread:$0]  %s117_s22, 128, %s322_s3, [#allocation3]  }
 0x122   :  { %227 = dma.done.wait [#allocation3], 128  }
 0x123   :  { %228 = vsyncadd [#allocation3], 4294967168 }
 0x124   :  { %123 = vsyncpa [#allocation3], 1 }

</bundles_post_ra>
